<compile_context>
chip_gen: v7x
topology: tpu7x:2x2x1
jax: 0.10.0
libtpu: 0.0.40
codegen_flags: <defaults>
</compile_context>

<pallas_src>
import jax
import jax.numpy as jnp
from jax.experimental import pallas as pl
from jax.experimental.pallas import tpu as pltpu

D_IN, D_H1, D_H2, D_OUT = 561, 256, 64, 32
BN_EPS = 1e-5

# Batch-tile size. Double-buffered 2048x561 f32 x-tiles are ~9 MiB of VMEM
# (half that in bf16) -- comfortably inside the 48 MiB scoped limit below on
# every generation (v5e/v6e: 128 MiB physical, v7x: 64 MiB).
DEFAULT_TILE_B = 2048
VMEM_LIMIT_BYTES = 48 * 1024 * 1024


def _round_up(x, m):
    return (x + m - 1) // m * m


def nn_encoder_kernel(x_ref, w1_ref, b1_ref, w23_ref, b23_ref, o_ref):
    # Cast x to the compute (weight) dtype in-register -- no wrapper HBM pass.
    x = x_ref[...].astype(w1_ref.dtype)
    # Layer 1: Linear(561, 256) with BN1 folded in; f32 accumulation on MXU.
    h1 = jnp.dot(x, w1_ref[...], preferred_element_type=jnp.float32) + b1_ref[...]
    # Layers 2 + 3 pre-composed offline into a single (256, 32) weight.
    h1 = h1.astype(w23_ref.dtype)
    out = jnp.dot(h1, w23_ref[...], preferred_element_type=jnp.float32) + b23_ref[...]
    o_ref[...] = out.astype(o_ref.dtype)


def fold_params(p, compute_dtype=jnp.bfloat16):
    """One-time constant fold: BN -> Linear, then compose layers 2 & 3.

    Weights are stored in `compute_dtype` (bf16 by default for native MXU
    throughput); biases stay f32 for the f32 epilogue.
    """
    s1 = p["g1"] * jax.lax.rsqrt(p["rv1"] + BN_EPS)            # (1, 256)
    w1f = p["w1"] * s1                                         # (561, 256)
    b1f = (p["b1"] - p["rm1"]) * s1 + p["beta1"]               # (1, 256)

    s2 = p["g2"] * jax.lax.rsqrt(p["rv2"] + BN_EPS)            # (1, 64)
    w2f = p["w2"] * s2                                         # (256, 64)
    b2f = (p["b2"] - p["rm2"]) * s2 + p["beta2"]               # (1, 64)

    w23 = w2f @ p["w3"]                                        # (256, 32)
    b23 = b2f @ p["w3"] + p["b3"]                              # (1, 32)
    return dict(
        w1=w1f.astype(compute_dtype),
        b1=b1f.astype(jnp.float32),
        w23=w23.astype(compute_dtype),
        b23=b23.astype(jnp.float32),
    )


def nn_encoder_forward(x, folded, *, tile_b=DEFAULT_TILE_B,
                       out_dtype=jnp.float32):
    """x: (B, 561) in any float dtype (bf16 preferred for halved read traffic).

    folded: output of fold_params (defines the compute dtype).
    Returns (B, 32) in out_dtype. No wrapper-side pad / cast / slice passes.
    """
    B = x.shape[0]

    # Clamp the tile for small batches; keep sublane (8) alignment.
    tb = min(tile_b, _round_up(B, 8))
    # For moderate/large batches guarantee >=2 grid steps so the "parallel"
    # batch axis actually shards across both TensorCores on v7x.
    if B > 256:
        tb = min(tb, _round_up(-(-B // 2), 128))

    grid = (pl.cdiv(B, tb),)   # ragged last block handled (masked) by Pallas

    w1, b1, w23, b23 = folded["w1"], folded["b1"], folded["w23"], folded["b23"]

    def resident(shape):
        # Constant index_map -> fetched once; single-buffered to save VMEM.
        return pl.BlockSpec(shape, lambda i: (0, 0),
                            pipeline_mode=pl.Buffered(1))

    # Advisory cost estimate reflecting real tiled HBM traffic:
    #   x read in its native dtype, weights once, output counted at 128-lane
    #   writeback granularity (D_OUT=32 < 128 lanes).
    x_bytes = B * D_IN * jnp.dtype(x.dtype).itemsize
    w_bytes = (D_IN * D_H1 + D_H1 * D_OUT) * jnp.dtype(w1.dtype).itemsize
    b_bytes = (D_H1 + D_OUT) * 4
    out_bytes = B * 128 * jnp.dtype(out_dtype).itemsize
    cost = pl.CostEstimate(
        flops=2 * B * (D_IN * D_H1 + D_H1 * D_OUT),
        transcendentals=0,
        bytes_accessed=x_bytes + w_bytes + b_bytes + out_bytes,
    )

    return pl.pallas_call(
        nn_encoder_kernel,
        out_shape=jax.ShapeDtypeStruct((B, D_OUT), out_dtype),
        grid=grid,
        in_specs=[
            pl.BlockSpec((tb, D_IN), lambda i: (i, 0)),   # streamed x tiles
            resident((D_IN, D_H1)),                       # w1 (BN1 folded)
            resident((1, D_H1)),                          # b1
            resident((D_H1, D_OUT)),                      # w23 (layers 2+3)
            resident((1, D_OUT)),                         # b23
        ],
        out_specs=pl.BlockSpec((tb, D_OUT), lambda i: (i, 0)),
        compiler_params=pltpu.CompilerParams(
            dimension_semantics=("parallel",),
            vmem_limit_bytes=VMEM_LIMIT_BYTES,
        ),
        cost_estimate=cost,
    )(x, w1, b1, w23, b23)


def init_params(key):
    """Deterministic synthetic parameters matching the PyTorch module shapes.

    Linear weights are stored as (in, out) == PyTorch weight.T.
    Bias / BN vectors are stored as (1, N) so they broadcast over batch.
    """
    ks = jax.random.split(key, 12)

    def lin(kw, kb, fan_in, fan_out):
        bound = 1.0 / jnp.sqrt(fan_in)
        w = jax.random.uniform(kw, (fan_in, fan_out), jnp.float32, -bound, bound)
        b = jax.random.uniform(kb, (1, fan_out), jnp.float32, -bound, bound)
        return w, b

    w1, b1 = lin(ks[0], ks[1], D_IN, D_H1)
    w2, b2 = lin(ks[2], ks[3], D_H1, D_H2)
    w3, b3 = lin(ks[4], ks[5], D_H2, D_OUT)

    def bn(kg, kb, n):
        g = 1.0 + 0.1 * jax.random.normal(kg, (1, n), jnp.float32)
        beta = 0.1 * jax.random.normal(kb, (1, n), jnp.float32)
        rm = 0.05 * jax.random.normal(jax.random.fold_in(kg, 7), (1, n), jnp.float32)
        rv = 1.0 + 0.1 * jax.random.uniform(jax.random.fold_in(kb, 7), (1, n), jnp.float32)
        return g, beta, rm, rv

    g1, beta1, rm1, rv1 = bn(ks[6], ks[7], D_H1)
    g2, beta2, rm2, rv2 = bn(ks[8], ks[9], D_H2)

    return dict(
        w1=w1, b1=b1, g1=g1, beta1=beta1, rm1=rm1, rv1=rv1,
        w2=w2, b2=b2, g2=g2, beta2=beta2, rm2=rm2, rv2=rv2,
        w3=w3, b3=b3,
    )


def reference_forward(x, p):
    """Pure-JAX reference of the unfolded eval-mode forward."""
    h1 = x @ p["w1"] + p["b1"]
    h1 = (h1 - p["rm1"]) / jnp.sqrt(p["rv1"] + BN_EPS) * p["g1"] + p["beta1"]
    h2 = h1 @ p["w2"] + p["b2"]
    h2 = (h2 - p["rm2"]) / jnp.sqrt(p["rv2"] + BN_EPS) * p["g2"] + p["beta2"]
    return h2 @ p["w3"] + p["b3"]


if __name__ == "__main__":
    key = jax.random.PRNGKey(0)
    kx, kp = jax.random.split(key)
    params = init_params(kp)

    # --- f32 path: exact eval-mode forward (validates folding + fusion). ---
    B = 8
    x = jax.random.normal(kx, (B, D_IN), jnp.float32)
    ref = reference_forward(x, params)
    folded_f32 = fold_params(params, compute_dtype=jnp.float32)
    out = jax.block_until_ready(nn_encoder_forward(x, folded_f32))
    assert out.shape == (B, D_OUT), out.shape
    assert jnp.allclose(out, ref, atol=1e-4, rtol=1e-4), float(
        jnp.max(jnp.abs(out - ref)))

    # --- ragged-grid path: B not a multiple of the tile (masked last block). -
    B2 = 200
    x2 = jax.random.normal(jax.random.fold_in(kx, 1), (B2, D_IN), jnp.float32)
    ref2 = reference_forward(x2, params)
    out2 = jax.block_until_ready(
        nn_encoder_forward(x2, folded_f32, tile_b=128))
    assert out2.shape == (B2, D_OUT), out2.shape
    assert jnp.allclose(out2, ref2, atol=1e-4, rtol=1e-4), float(
        jnp.max(jnp.abs(out2 - ref2)))

    # --- default bf16-streaming path: bf16 x from the producer, bf16 weights,
    #     f32 accumulation, bf16 output (halved read + writeback traffic). ---
    folded_bf16 = fold_params(params)   # compute_dtype defaults to bfloat16
    out_bf16 = jax.block_until_ready(
        nn_encoder_forward(x.astype(jnp.bfloat16), folded_bf16,
                           out_dtype=jnp.bfloat16))
    assert out_bf16.shape == (B, D_OUT)
    out_bf16_f32 = out_bf16.astype(jnp.float32)
    assert bool(jnp.all(jnp.isfinite(out_bf16_f32)))
    # Looser tolerance: the K=561 contraction sees bf16 input rounding.
    assert jnp.allclose(out_bf16_f32, ref, atol=0.25, rtol=0.25)

    print("KERNEL_OK")
</pallas_src>

<mosaic_0001>
module attributes {stable_mosaic.version = 11 : i64} {
  func.func @nn_encoder_kernel(%arg0: i32, %arg1: memref<8x561xf32, #tpu.memory_space<vmem>>, %arg2: memref<561x256xf32, #tpu.memory_space<vmem>>, %arg3: memref<1x256xf32, #tpu.memory_space<vmem>>, %arg4: memref<256x32xf32, #tpu.memory_space<vmem>>, %arg5: memref<1x32xf32, #tpu.memory_space<vmem>>, %arg6: memref<8x32xf32, #tpu.memory_space<vmem>>) attributes {dimension_semantics = [#tpu.dimension_semantics<parallel>], iteration_bounds = array<i64: 1>, scalar_prefetch = 0 : i64, scratch_operands = 0 : i64, tpu.core_type = #tpu.core_type<tc>, window_params = [{transform_indices = @transform_0, window_bounds = array<i64: 8, 561>}, {pipeline_mode = #tpu.pipeline_mode<synchronous>, transform_indices = @transform_1, window_bounds = array<i64: 561, 256>}, {pipeline_mode = #tpu.pipeline_mode<synchronous>, transform_indices = @transform_2, window_bounds = array<i64: 1, 256>}, {pipeline_mode = #tpu.pipeline_mode<synchronous>, transform_indices = @transform_3, window_bounds = array<i64: 256, 32>}, {pipeline_mode = #tpu.pipeline_mode<synchronous>, transform_indices = @transform_4, window_bounds = array<i64: 1, 32>}, {transform_indices = @transform_5, window_bounds = array<i64: 8, 32>}]} {
    %c0 = arith.constant 0 : index
    %c0_0 = arith.constant 0 : index
    %0 = vector.load %arg1[%c0, %c0_0] : memref<8x561xf32, #tpu.memory_space<vmem>>, vector<8x561xf32>
    %c0_1 = arith.constant 0 : index
    %c0_2 = arith.constant 0 : index
    %1 = vector.load %arg2[%c0_1, %c0_2] : memref<561x256xf32, #tpu.memory_space<vmem>>, vector<561x256xf32>
    %cst = arith.constant dense<0.000000e+00> : vector<8x256xf32>
    %2 = tpu.matmul %0, %1, %cst {dimension_numbers = #tpu.dot_dimension_numbers<[1], [0], [0], [1], [0, 0, 1, 1], [], []>} : vector<8x561xf32>, vector<561x256xf32>, vector<8x256xf32> -> vector<8x256xf32>
    %c0_3 = arith.constant 0 : index
    %c0_4 = arith.constant 0 : index
    %3 = vector.load %arg3[%c0_3, %c0_4] : memref<1x256xf32, #tpu.memory_space<vmem>>, vector<1x256xf32>
    %4 = vector.broadcast %3 : vector<1x256xf32> to vector<8x256xf32>
    %5 = arith.addf %2, %4 : vector<8x256xf32>
    %c0_5 = arith.constant 0 : index
    %c0_6 = arith.constant 0 : index
    %6 = vector.load %arg4[%c0_5, %c0_6] : memref<256x32xf32, #tpu.memory_space<vmem>>, vector<256x32xf32>
    %cst_7 = arith.constant dense<0.000000e+00> : vector<8x32xf32>
    %7 = tpu.matmul %5, %6, %cst_7 {dimension_numbers = #tpu.dot_dimension_numbers<[1], [0], [0], [1], [0, 0, 1, 1], [], []>} : vector<8x256xf32>, vector<256x32xf32>, vector<8x32xf32> -> vector<8x32xf32>
    %c0_8 = arith.constant 0 : index
    %c0_9 = arith.constant 0 : index
    %8 = vector.load %arg5[%c0_8, %c0_9] : memref<1x32xf32, #tpu.memory_space<vmem>>, vector<1x32xf32>
    %9 = vector.broadcast %8 : vector<1x32xf32> to vector<8x32xf32>
    %10 = arith.addf %7, %9 : vector<8x32xf32>
    %c0_10 = arith.constant 0 : index
    %c0_11 = arith.constant 0 : index
    %11 = vector.load %arg6[%c0_10, %c0_11] : memref<8x32xf32, #tpu.memory_space<vmem>>, vector<8x32xf32>
    tpu.vector_store %arg6[%c0_10, %c0_11], %10 {strides = array<i32>} : memref<8x32xf32, #tpu.memory_space<vmem>>, vector<8x32xf32>,
    return
  }
  func.func @transform_0(%arg0: i32) -> (i32, i32) {
    %c0_i32 = arith.constant 0 : i32
    %c0_i32_0 = arith.constant 0 : i32
    return %arg0, %c0_i32 : i32, i32
  }
  func.func @transform_1(%arg0: i32) -> (i32, i32) {
    %c0_i32 = arith.constant 0 : i32
    %c0_i32_0 = arith.constant 0 : i32
    %c0_i32_1 = arith.constant 0 : i32
    return %c0_i32, %c0_i32_0 : i32, i32
  }
  func.func @transform_2(%arg0: i32) -> (i32, i32) {
    %c0_i32 = arith.constant 0 : i32
    %c0_i32_0 = arith.constant 0 : i32
    %c0_i32_1 = arith.constant 0 : i32
    return %c0_i32, %c0_i32_0 : i32, i32
  }
  func.func @transform_3(%arg0: i32) -> (i32, i32) {
    %c0_i32 = arith.constant 0 : i32
    %c0_i32_0 = arith.constant 0 : i32
    %c0_i32_1 = arith.constant 0 : i32
    return %c0_i32, %c0_i32_0 : i32, i32
  }
  func.func @transform_4(%arg0: i32) -> (i32, i32) {
    %c0_i32 = arith.constant 0 : i32
    %c0_i32_0 = arith.constant 0 : i32
    %c0_i32_1 = arith.constant 0 : i32
    return %c0_i32, %c0_i32_0 : i32, i32
  }
  func.func @transform_5(%arg0: i32) -> (i32, i32) {
    %c0_i32 = arith.constant 0 : i32
    %c0_i32_0 = arith.constant 0 : i32
    return %arg0, %c0_i32 : i32, i32
  }
}

</mosaic_0001>

<bundles_post_ra>
// kernel: tpu_custom_call.1
= control target key start
LH: loop header
LB: loop body
LE: loop exit
PB: predicated region body
PF: predicated region fallthrough
CT: control target
= control target key end

     0   :  { %10 = vsyncpa [#allocation3], 0  ;;  %s992_s0 = inlined_call_operand.vmem [shape: f32[8,561], index: 0, kind: input, shape index: {}]   ;;  %s993_s1 = inlined_call_operand.hbm [shape: f32[561,256], index: 1, kind: input, shape index: {}]   ;;  %s994_s2 = inlined_call_operand.vmem [shape: f32[1,256], index: 2, kind: input, shape index: {}]   ;;  %s995_s3 = inlined_call_operand.vmem [shape: f32[256,32], index: 3, kind: input, shape index: {}]   ;;  %s996_s4 = inlined_call_operand.vmem [shape: f32[1,32], index: 4, kind: input, shape index: {}]   ;;  %s997_s5 = inlined_call_operand.hbm [shape: f32[8,32], index: 5, kind: output, shape index: {}]  }
   0x1   :  { %11 = vsyncpa [#allocation4], 0  ;;  %s814_s18 = smov [#allocation2]   ;;  %s766_s22 = scalar_lea.hbm %s993_s1, 18176 }
   0x2   :  { %s19_s19 = sshll.u32 %s814_s18, 4  ;;  %p767_p0 = scmp.ne.s32.totalorder %s993_s1, %s766_s22  ;;  %s20_s19 = int_to_ptr.vmem [resolvable:$true] %s19_s19 }
   0x3   :  { %p770_p1 = scmp.lt.u32.totalorder %s766_s22, %s993_s1 }
   0x5   :  { %p772_p2 = pnand %p770_p1, %p767_p0 }
   0x7   :  { %775 = shalt.err (!%p772_p2)
}
   0x8   :  { %s776_s27 = scalar_lea.vmem %s20_s19, 18176  ;;  %p781_p4 = scmp.lt.s32.totalorder %s20_s19, %s20_s19 }
   0x9   :  { %p777_p3 = scmp.ne.s32.totalorder %s20_s19, %s776_s27  ;;  %p782_p5 = scmp.lt.s32.totalorder %s776_s27, %s776_s27 }
   0xb   :  { %p783_p6 = por %p782_p5, %p781_p4 }
   0xd   :  { %p784_p7 = pnand %p783_p6, %p777_p3 }
   0xf   :  { %787 = shalt.err (!%p784_p7)
}
  0x10   :  { %s815_s28 = smov 256   ;;  %s816_s29 = smov 16  }
  0x11   :  { %25 = dma.hbm_to_vmem [thread:$0]  %s993_s1, 18176, %s20_s19, [#allocation3], %s815_s28, %s815_s28, %s816_s29  }
  0x12   :  { %810 = dma.done.wait [#allocation3], 18176  }
  0x13   :  { %811 = vsyncadd [#allocation3], 4294949120  ;;  %v105_v0 = vld [vmem:[#allocation2 + $0x208] sm:$0xff]  ;;  %v107_v1 = vld [vmem:[#allocation2 + $0x218] sm:$0xff]  ;;  %vm198_vm0 = vcmask 1040384   ;;  %vm194_vm1 = vcmask 400384  }
  0x14   :  { %v104_v2 = vld [vmem:[#allocation2 + $0x200] sm:$0xff]  ;;  %v647_v3 = vpack.c.bf16 %v107_v1, %v105_v0  ;;  %v106_v4 = vld [vmem:[#allocation2 + $0x210] sm:$0xff]  ;;  %v109_v5 = vld [vmem:[#allocation2 + $0x228] sm:$0xff]  ;;  %vm527_vm2 = vcmask 261120  }
  0x15   :  { %v111_v6 = vld [vmem:[#allocation2 + $0x238] sm:$0xff]  ;;  %v649_v7 = vpack.c.bf16 %v106_v4, %v104_v2  ;;  %v108_v9 = vld [vmem:[#allocation2 + $0x220] sm:$0xff]  ;;  %v110_v10 = vld [vmem:[#allocation2 + $0x230] sm:$0xff] }
  0x16   :  { %v651_v8 = vpack.c.bf16 %v111_v6, %v109_v5  ;;  %v113_v11 = vld [vmem:[#allocation2 + $0x248] sm:$0xff]  ;;  %648 = vmatprep.subr.bf16.mxu0 %v647_v3  ;;  %v115_v12 = vld [vmem:[#allocation2 + $0x258] sm:$0xff]  ;;  %v653_v13 = vpack.c.bf16 %v110_v10, %v108_v9  ;;  %v112_v14 = vld [vmem:[#allocation2 + $0x240] sm:$0xff] }
  0x17   :  { %650 = vmatpush1.bf16.msra.mxu0 %v649_v7  ;;  %v41_v15 = vld [vmem:[#allocation2 + $0x8] sm:$0xff]  ;;  %v43_v16 = vld [vmem:[#allocation2 + $0x18] sm:$0xff]  ;;  %v655_v17 = vpack.c.bf16 %v115_v12, %v113_v11  ;;  %v114_v18 = vld [vmem:[#allocation2 + $0x250] sm:$0xff] }
  0x18   :  { %652 = vmatprep.subr.bf16.mxu0 %v651_v8  ;;  %v583_v19 = vpack.c.bf16 %v43_v16, %v41_v15  ;;  %v40_v20 = vld [vmem:[#allocation2] sm:$0xff]  ;;  %v42_v21 = vld [vmem:[#allocation2 + $0x10] sm:$0xff]  ;;  %v117_v22 = vld [vmem:[#allocation2 + $0x268] sm:$0xff]  ;;  %v657_v27 = vpack.c.bf16 %v114_v18, %v112_v14 }
  0x19   :  { %v119_v23 = vld [vmem:[#allocation2 + $0x278] sm:$0xff]  ;;  %v585_v24 = vpack.c.bf16 %v42_v21, %v40_v20  ;;  %v45_v25 = vld [vmem:[#allocation2 + $0x28] sm:$0xff]  ;;  %v116_v28 = vld [vmem:[#allocation2 + $0x260] sm:$0xff] }
  0x1a   :  { %584 = vmatprep.subr.bf16.mxu1 %v583_v19  ;;  %v47_v26 = vld [vmem:[#allocation2 + $0x38] sm:$0xff]  ;;  %v44_v30 = vld [vmem:[#allocation2 + $0x20] sm:$0xff]  ;;  %v46_v31 = vld [vmem:[#allocation2 + $0x30] sm:$0xff]  ;;  %v659_v32 = vpack.c.bf16 %v119_v23, %v117_v22 }
  0x1b   :  { %654 = vmatpush1.bf16.msra.mxu0 %v653_v13  ;;  %586 = vmatpush1.bf16.msra.mxu1 %v585_v24  ;;  %v587_v29 = vpack.c.bf16 %v47_v26, %v45_v25  ;;  %v118_v33 = vld [vmem:[#allocation2 + $0x270] sm:$0xff]  ;;  %v589_v34 = vpack.c.bf16 %v46_v31, %v44_v30  ;;  %v49_v35 = vld [vmem:[#allocation2 + $0x48] sm:$0xff]  ;;  %v51_v36 = vld [vmem:[#allocation2 + $0x58] sm:$0xff] }
  0x1c   :  { %656 = vmatprep.subr.bf16.mxu0 %v655_v17  ;;  %v121_v37 = vld [vmem:[#allocation2 + $0x288] sm:$0xff]  ;;  %v123_v38 = vld [vmem:[#allocation2 + $0x298] sm:$0xff]  ;;  %v591_v39 = vpack.c.bf16 %v51_v36, %v49_v35  ;;  %v48_v40 = vld [vmem:[#allocation2 + $0x40] sm:$0xff]  ;;  %v661_v42 = vpack.c.bf16 %v118_v33, %v116_v28 }
  0x1d   :  { %588 = vmatprep.subr.bf16.mxu1 %v587_v29  ;;  %v50_v41 = vld [vmem:[#allocation2 + $0x50] sm:$0xff]  ;;  %v120_v43 = vld [vmem:[#allocation2 + $0x280] sm:$0xff]  ;;  %v53_v45 = vld [vmem:[#allocation2 + $0x68] sm:$0xff]  ;;  %v663_v47 = vpack.c.bf16 %v123_v38, %v121_v37 }
  0x1e   :  { %v593_v44 = vpack.c.bf16 %v50_v41, %v48_v40  ;;  %v55_v46 = vld [vmem:[#allocation2 + $0x78] sm:$0xff]  ;;  %v122_v48 = vld [vmem:[#allocation2 + $0x290] sm:$0xff]  ;;  %v52_v50 = vld [vmem:[#allocation2 + $0x60] sm:$0xff] }
  0x1f   :  { %658 = vmatpush1.bf16.msra.mxu0 %v657_v27  ;;  %590 = vmatpush1.bf16.msra.mxu1 %v589_v34  ;;  %v595_v49 = vpack.c.bf16 %v55_v46, %v53_v45  ;;  %v54_v51 = vld [vmem:[#allocation2 + $0x70] sm:$0xff]  ;;  %v125_v52 = vld [vmem:[#allocation2 + $0x2a8] sm:$0xff]  ;;  %v127_v53 = vld [vmem:[#allocation2 + $0x2b8] sm:$0xff]  ;;  %v665_v56 = vpack.c.bf16 %v122_v48, %v120_v43 }
  0x20   :  { %660 = vmatprep.subr.bf16.mxu0 %v659_v32  ;;  %592 = vmatprep.subr.bf16.mxu1 %v591_v39  ;;  %v57_v54 = vld [vmem:[#allocation2 + $0x88] sm:$0xff]  ;;  %v59_v55 = vld [vmem:[#allocation2 + $0x98] sm:$0xff]  ;;  %v124_v57 = vld [vmem:[#allocation2 + $0x2a0] sm:$0xff]  ;;  %v597_v59 = vpack.c.bf16 %v54_v51, %v52_v50  ;;  %v667_v60 = vpack.c.bf16 %v127_v53, %v125_v52 }
  0x21   :  { %v126_v58 = vld [vmem:[#allocation2 + $0x2b0] sm:$0xff]  ;;  %v129_v61 = vld [vmem:[#allocation2 + $0x2c8] sm:$0xff]  ;;  %v599_v62 = vpack.c.bf16 %v59_v55, %v57_v54  ;;  %v56_v63 = vld [vmem:[#allocation2 + $0x80] sm:$0xff] }
  0x22   :  { %v58_v0 = vld [vmem:[#allocation2 + $0x90] sm:$0xff]  ;;  %v131_v1 = vld [vmem:[#allocation2 + $0x2d8] sm:$0xff]  ;;  %v61_v2 = vld [vmem:[#allocation2 + $0xa8] sm:$0xff]  ;;  %v669_v4 = vpack.c.bf16 %v126_v58, %v124_v57 }
  0x23   :  { %662 = vmatpush1.bf16.msra.mxu0 %v661_v42  ;;  %594 = vmatpush1.bf16.msra.mxu1 %v593_v44  ;;  %v63_v3 = vld [vmem:[#allocation2 + $0xb8] sm:$0xff]  ;;  %v128_v5 = vld [vmem:[#allocation2 + $0x2c0] sm:$0xff]  ;;  %v130_v6 = vld [vmem:[#allocation2 + $0x2d0] sm:$0xff]  ;;  %v601_v7 = vpack.c.bf16 %v58_v0, %v56_v63  ;;  %v671_v8 = vpack.c.bf16 %v131_v1, %v129_v61 }
  0x24   :  { %664 = vmatprep.subr.bf16.mxu0 %v663_v47  ;;  %596 = vmatprep.subr.bf16.mxu1 %v595_v49  ;;  %v133_v9 = vld [vmem:[#allocation2 + $0x2e8] sm:$0xff]  ;;  %v603_v10 = vpack.c.bf16 %v63_v3, %v61_v2  ;;  %v60_v11 = vld [vmem:[#allocation2 + $0xa0] sm:$0xff]  ;;  %v62_v12 = vld [vmem:[#allocation2 + $0xb0] sm:$0xff]  ;;  %v673_v16 = vpack.c.bf16 %v130_v6, %v128_v5 }
  0x25   :  { %v135_v13 = vld [vmem:[#allocation2 + $0x2f8] sm:$0xff]  ;;  %v65_v14 = vld [vmem:[#allocation2 + $0xc8] sm:$0xff]  ;;  %v132_v17 = vld [vmem:[#allocation2 + $0x2e0] sm:$0xff]  ;;  %v605_v19 = vpack.c.bf16 %v62_v12, %v60_v11 }
  0x26   :  { %v67_v15 = vld [vmem:[#allocation2 + $0xd8] sm:$0xff]  ;;  %v134_v18 = vld [vmem:[#allocation2 + $0x2f0] sm:$0xff]  ;;  %v675_v20 = vpack.c.bf16 %v135_v13, %v133_v9  ;;  %v137_v21 = vld [vmem:[#allocation2 + $0x308] sm:$0xff] }
  0x27   :  { %666 = vmatpush1.bf16.msra.mxu0 %v665_v56  ;;  %598 = vmatpush1.bf16.msra.mxu1 %v597_v59  ;;  %v607_v22 = vpack.c.bf16 %v67_v15, %v65_v14  ;;  %v64_v23 = vld [vmem:[#allocation2 + $0xc0] sm:$0xff]  ;;  %v66_v24 = vld [vmem:[#allocation2 + $0xd0] sm:$0xff]  ;;  %v139_v25 = vld [vmem:[#allocation2 + $0x318] sm:$0xff]  ;;  %v677_v28 = vpack.c.bf16 %v134_v18, %v132_v17 }
  0x28   :  { %668 = vmatprep.subr.bf16.mxu0 %v667_v60  ;;  %600 = vmatprep.subr.bf16.mxu1 %v599_v62  ;;  %v69_v26 = vld [vmem:[#allocation2 + $0xe8] sm:$0xff]  ;;  %v71_v27 = vld [vmem:[#allocation2 + $0xf8] sm:$0xff]  ;;  %v136_v29 = vld [vmem:[#allocation2 + $0x300] sm:$0xff]  ;;  %v609_v31 = vpack.c.bf16 %v66_v24, %v64_v23  ;;  %v679_v32 = vpack.c.bf16 %v139_v25, %v137_v21 }
  0x29   :  { %v138_v30 = vld [vmem:[#allocation2 + $0x310] sm:$0xff]  ;;  %v141_v33 = vld [vmem:[#allocation2 + $0x328] sm:$0xff]  ;;  %v611_v34 = vpack.c.bf16 %v71_v27, %v69_v26  ;;  %v68_v35 = vld [vmem:[#allocation2 + $0xe0] sm:$0xff] }
  0x2a   :  { %v70_v36 = vld [vmem:[#allocation2 + $0xf0] sm:$0xff]  ;;  %v143_v37 = vld [vmem:[#allocation2 + $0x338] sm:$0xff]  ;;  %v73_v38 = vld [vmem:[#allocation2 + $0x108] sm:$0xff]  ;;  %v681_v40 = vpack.c.bf16 %v138_v30, %v136_v29 }
  0x2b   :  { %670 = vmatpush1.bf16.msra.mxu0 %v669_v4  ;;  %602 = vmatpush1.bf16.msra.mxu1 %v601_v7  ;;  %v75_v39 = vld [vmem:[#allocation2 + $0x118] sm:$0xff]  ;;  %v140_v41 = vld [vmem:[#allocation2 + $0x320] sm:$0xff]  ;;  %v142_v42 = vld [vmem:[#allocation2 + $0x330] sm:$0xff]  ;;  %v613_v43 = vpack.c.bf16 %v70_v36, %v68_v35  ;;  %v683_v44 = vpack.c.bf16 %v143_v37, %v141_v33 }
  0x2c   :  { %672 = vmatprep.subr.bf16.mxu0 %v671_v8  ;;  %604 = vmatprep.subr.bf16.mxu1 %v603_v10  ;;  %v145_v45 = vld [vmem:[#allocation2 + $0x348] sm:$0xff]  ;;  %v615_v46 = vpack.c.bf16 %v75_v39, %v73_v38  ;;  %v72_v47 = vld [vmem:[#allocation2 + $0x100] sm:$0xff]  ;;  %v74_v48 = vld [vmem:[#allocation2 + $0x110] sm:$0xff]  ;;  %v685_v52 = vpack.c.bf16 %v142_v42, %v140_v41 }
  0x2d   :  { %v147_v49 = vld [vmem:[#allocation2 + $0x358] sm:$0xff]  ;;  %v77_v50 = vld [vmem:[#allocation2 + $0x128] sm:$0xff]  ;;  %v144_v53 = vld [vmem:[#allocation2 + $0x340] sm:$0xff]  ;;  %v617_v55 = vpack.c.bf16 %v74_v48, %v72_v47 }
  0x2e   :  { %v79_v51 = vld [vmem:[#allocation2 + $0x138] sm:$0xff]  ;;  %v146_v54 = vld [vmem:[#allocation2 + $0x350] sm:$0xff]  ;;  %v687_v56 = vpack.c.bf16 %v147_v49, %v145_v45  ;;  %v149_v57 = vld [vmem:[#allocation2 + $0x368] sm:$0xff] }
  0x2f   :  { %674 = vmatpush1.bf16.msra.mxu0 %v673_v16  ;;  %606 = vmatpush1.bf16.msra.mxu1 %v605_v19  ;;  %v619_v58 = vpack.c.bf16 %v79_v51, %v77_v50  ;;  %v76_v59 = vld [vmem:[#allocation2 + $0x120] sm:$0xff]  ;;  %v78_v60 = vld [vmem:[#allocation2 + $0x130] sm:$0xff]  ;;  %v151_v61 = vld [vmem:[#allocation2 + $0x378] sm:$0xff]  ;;  %v689_v1 = vpack.c.bf16 %v146_v54, %v144_v53 }
  0x30   :  { %676 = vmatprep.subr.bf16.mxu0 %v675_v20  ;;  %608 = vmatprep.subr.bf16.mxu1 %v607_v22  ;;  %v81_v62 = vld [vmem:[#allocation2 + $0x148] sm:$0xff]  ;;  %v83_v63 = vld [vmem:[#allocation2 + $0x158] sm:$0xff]  ;;  %v148_v2 = vld [vmem:[#allocation2 + $0x360] sm:$0xff]  ;;  %v621_v4 = vpack.c.bf16 %v78_v60, %v76_v59  ;;  %v691_v5 = vpack.c.bf16 %v151_v61, %v149_v57 }
  0x31   :  { %v38_v0 = vld [vmem:[%s992_s0 + $0x18] sm:$0xff]  ;;  %v150_v3 = vld [vmem:[#allocation2 + $0x370] sm:$0xff]  ;;  %v153_v6 = vld [vmem:[#allocation2 + $0x388] sm:$0xff]  ;;  %v623_v7 = vpack.c.bf16 %v83_v63, %v81_v62 }
  0x32   :  { %v80_v8 = vld [vmem:[#allocation2 + $0x140] sm:$0xff]  ;;  %v82_v9 = vld [vmem:[#allocation2 + $0x150] sm:$0xff]  ;;  %v155_v10 = vld [vmem:[#allocation2 + $0x398] sm:$0xff]  ;;  %340 = vmatprep.mubr.f32.mxu0 %v38_v0  ;;  %v693_v13 = vpack.c.bf16 %v150_v3, %v148_v2 }
  0x33   :  { %678 = vmatpush1.bf16.msra.mxu0 %v677_v28  ;;  %610 = vmatpush1.bf16.msra.mxu1 %v609_v31  ;;  %v85_v11 = vld [vmem:[#allocation2 + $0x168] sm:$0xff]  ;;  %v87_v12 = vld [vmem:[#allocation2 + $0x178] sm:$0xff]  ;;  %v152_v14 = vld [vmem:[#allocation2 + $0x380] sm:$0xff]  ;;  %v625_v16 = vpack.c.bf16 %v82_v9, %v80_v8  ;;  %v695_v17 = vpack.c.bf16 %v155_v10, %v153_v6 }
  0x34   :  { %680 = vmatprep.subr.bf16.mxu0 %v679_v32  ;;  %612 = vmatprep.subr.bf16.mxu1 %v611_v34  ;;  %v154_v15 = vld [vmem:[#allocation2 + $0x390] sm:$0xff]  ;;  %v157_v18 = vld [vmem:[#allocation2 + $0x3a8] sm:$0xff]  ;;  %v627_v19 = vpack.c.bf16 %v87_v12, %v85_v11  ;;  %v84_v20 = vld [vmem:[#allocation2 + $0x160] sm:$0xff] }
  0x35   :  { %v86_v21 = vld [vmem:[#allocation2 + $0x170] sm:$0xff]  ;;  %v159_v22 = vld [vmem:[#allocation2 + $0x3b8] sm:$0xff]  ;;  %v89_v23 = vld [vmem:[#allocation2 + $0x188] sm:$0xff]  ;;  %v697_v26 = vpack.c.bf16 %v154_v15, %v152_v14 }
  0x36   :  { %v91_v24 = vld [vmem:[#allocation2 + $0x198] sm:$0xff]  ;;  %v36_v25 = vld [vmem:[%s992_s0 + $0x8] sm:$0xff]  ;;  %v156_v27 = vld [vmem:[#allocation2 + $0x3a0] sm:$0xff]  ;;  %v629_v29 = vpack.c.bf16 %v86_v21, %v84_v20  ;;  %v699_v30 = vpack.c.bf16 %v159_v22, %v157_v18 }
  0x37   :  { %682 = vmatpush1.bf16.msra.mxu0 %v681_v40  ;;  %614 = vmatpush1.bf16.msra.mxu1 %v613_v43  ;;  %v158_v28 = vld [vmem:[#allocation2 + $0x3b0] sm:$0xff]  ;;  %v161_v31 = vld [vmem:[#allocation2 + $0x3c8] sm:$0xff]  ;;  %v631_v32 = vpack.c.bf16 %v91_v24, %v89_v23  ;;  %v88_v33 = vld [vmem:[#allocation2 + $0x180] sm:$0xff] }
  0x38   :  { %684 = vmatprep.subr.bf16.mxu0 %v683_v44  ;;  %616 = vmatprep.subr.bf16.mxu1 %v615_v46  ;;  %v90_v34 = vld [vmem:[#allocation2 + $0x190] sm:$0xff]  ;;  %v163_v35 = vld [vmem:[#allocation2 + $0x3d8] sm:$0xff]  ;;  %v93_v36 = vld [vmem:[#allocation2 + $0x1a8] sm:$0xff]  ;;  %v701_v38 = vpack.c.bf16 %v158_v28, %v156_v27 }
  0x39   :  { %v95_v37 = vld [vmem:[#allocation2 + $0x1b8] sm:$0xff]  ;;  %269 = vmatprep.mubr.f32.mxu1 %v36_v25  ;;  %v160_v39 = vld [vmem:[#allocation2 + $0x3c0] sm:$0xff]  ;;  %v162_v40 = vld [vmem:[#allocation2 + $0x3d0] sm:$0xff]  ;;  %v633_v41 = vpack.c.bf16 %v90_v34, %v88_v33  ;;  %v703_v42 = vpack.c.bf16 %v163_v35, %v161_v31 }
  0x3a   :  { %v165_v43 = vld [vmem:[#allocation2 + $0x3e8] sm:$0xff]  ;;  %v635_v44 = vpack.c.bf16 %v95_v37, %v93_v36  ;;  %v92_v45 = vld [vmem:[#allocation2 + $0x1a0] sm:$0xff]  ;;  %v94_v46 = vld [vmem:[#allocation2 + $0x1b0] sm:$0xff]  ;;  %v705_v50 = vpack.c.bf16 %v162_v40, %v160_v39 }
  0x3b   :  { %686 = vmatpush1.bf16.msra.mxu0 %v685_v52  ;;  %618 = vmatpush1.bf16.msra.mxu1 %v617_v55  ;;  %v167_v47 = vld [vmem:[#allocation2 + $0x3f8] sm:$0xff]  ;;  %v97_v48 = vld [vmem:[#allocation2 + $0x1c8] sm:$0xff]  ;;  %v164_v51 = vld [vmem:[#allocation2 + $0x3e0] sm:$0xff]  ;;  %v637_v53 = vpack.c.bf16 %v94_v46, %v92_v45 }
  0x3c   :  { %688 = vmatprep.subr.bf16.mxu0 %v687_v56  ;;  %620 = vmatprep.subr.bf16.mxu1 %v619_v58  ;;  %v99_v49 = vld [vmem:[#allocation2 + $0x1d8] sm:$0xff]  ;;  %v166_v52 = vld [vmem:[#allocation2 + $0x3f0] sm:$0xff]  ;;  %v707_v54 = vpack.c.bf16 %v167_v47, %v165_v43  ;;  %v169_v55 = vld [vmem:[#allocation2 + $0x408] sm:$0xff] }
  0x3d   :  { %v639_v56 = vpack.c.bf16 %v99_v49, %v97_v48  ;;  %v96_v57 = vld [vmem:[#allocation2 + $0x1c0] sm:$0xff]  ;;  %v98_v58 = vld [vmem:[#allocation2 + $0x1d0] sm:$0xff]  ;;  %v171_v59 = vld [vmem:[#allocation2 + $0x418] sm:$0xff]  ;;  %v709_v62 = vpack.c.bf16 %v166_v52, %v164_v51 }
  0x3e   :  { %v101_v60 = vld [vmem:[#allocation2 + $0x1e8] sm:$0xff]  ;;  %v103_v61 = vld [vmem:[#allocation2 + $0x1f8] sm:$0xff]  ;;  %v168_v63 = vld [vmem:[#allocation2 + $0x400] sm:$0xff]  ;;  %v641_v0 = vpack.c.bf16 %v98_v58, %v96_v57 }
  0x3f   :  { %690 = vmatpush1.bf16.msra.mxu0 %v689_v1  ;;  %622 = vmatpush1.bf16.msra.mxu1 %v621_v4  ;;  %v711_v1 = vpack.c.bf16 %v171_v59, %v169_v55  ;;  %v170_v2 = vld [vmem:[#allocation2 + $0x410] sm:$0xff]  ;;  %v643_v3 = vpack.c.bf16 %v103_v61, %v101_v60  ;;  %v100_v4 = vld [vmem:[#allocation2 + $0x1e0] sm:$0xff]  ;;  %v173_v6 = vld [vmem:[#allocation2 + $0x428] sm:$0xff] }
  0x40   :  { %692 = vmatprep.subr.bf16.mxu0 %v691_v5  ;;  %624 = vmatprep.subr.bf16.mxu1 %v623_v7  ;;  %v102_v5 = vld [vmem:[#allocation2 + $0x1f0] sm:$0xff]  ;;  %v175_v7 = vld [vmem:[#allocation2 + $0x438] sm:$0xff]  ;;  %v434_v8 = vld [vmem:[%s995_s3 + $0x80] sm:$0xff]  ;;  %v713_v11 = vpack.c.bf16 %v170_v2, %v168_v63 }
  0x41   :  { %v435_v9 = vld [vmem:[%s995_s3 + $0x88] sm:$0xff]  ;;  %v37_v10 = vld [vmem:[%s992_s0 + $0x10] sm:$0xff]  ;;  %v172_v12 = vld [vmem:[#allocation2 + $0x420] sm:$0xff]  ;;  %v645_v14 = vpack.c.bf16 %v102_v5, %v100_v4  ;;  %v715_v15 = vpack.c.bf16 %v175_v7, %v173_v6 }
  0x42   :  { %v419_v18 = vld [vmem:[%s995_s3 + $0x8] sm:$0xff]  ;;  %v723_v20 = vpack.c.bf16 %v435_v9, %v434_v8  ;;  %v436_v21 = vld [vmem:[%s995_s3 + $0x90] sm:$0xff]  ;;  %v437_v22 = vld [vmem:[%s995_s3 + $0x98] sm:$0xff] }
  0x43   :  { %694 = vmatpush1.bf16.msra.mxu0 %v693_v13  ;;  %626 = vmatpush1.bf16.msra.mxu1 %v625_v16  ;;  %v174_v13 = vld [vmem:[#allocation2 + $0x430] sm:$0xff]  ;;  %v177_v16 = vld [vmem:[#allocation2 + $0x448] sm:$0xff]  ;;  %v176_v24 = vld [vmem:[#allocation2 + $0x440] sm:$0xff] }
  0x44   :  { %696 = vmatprep.subr.bf16.mxu0 %v695_v17  ;;  %628 = vmatprep.subr.bf16.mxu1 %v627_v19  ;;  %v418_v17 = vld [vmem:[%s995_s3] sm:$0xff]  ;;  %v179_v19 = vld [vmem:[#allocation2 + $0x458] sm:$0xff]  ;;  %v717_v23 = vpack.c.bf16 %v174_v13, %v172_v12  ;;  %v178_v28 = vld [vmem:[#allocation2 + $0x450] sm:$0xff] }
  0x45   :  { %v35_v25 = vld [vmem:[%s992_s0] sm:$0xff]  ;;  %v719_v27 = vpack.c.bf16 %v179_v19, %v177_v16  ;;  %v420_v31 = vld [vmem:[%s995_s3 + $0x10] sm:$0xff]  ;;  %v439_v34 = vld [vmem:[%s995_s3 + $0xa8] sm:$0xff]  ;;  %v721_v35 = vpack.c.bf16 %v178_v28, %v176_v24 }
  0x46   :  { %v438_v33 = vld [vmem:[%s995_s3 + $0xa0] sm:$0xff]  ;;  %v423_v39 = vld [vmem:[%s995_s3 + $0x28] sm:$0xff]  ;;  %v424_v46 = vld [vmem:[%s995_s3 + $0x30] sm:$0xff] }
  0x47   :  { %698 = vmatpush1.bf16.msra.mxu0 %v697_v26  ;;  %630 = vmatpush1.bf16.msra.mxu1 %v629_v29  ;;  %v725_v26 = vpack.c.bf16 %v419_v18, %v418_v17  ;;  %v817_v29 = vmov 0.0   ;;  %v731_v37 = vpack.c.bf16 %v439_v34, %v438_v33  ;;  %v181_v40 = vld [vmem:[#allocation2 + $0x468] sm:$0x1]  ;;  %v425_v47 = vld [vmem:[%s995_s3 + $0x38] sm:$0xff]  ;;  %v39_v48 = vld [vmem:[%s992_s0 + $0x20] sm:$0xff] }
  0x48   :  { %700 = vmatprep.subr.bf16.mxu0 %v699_v30  ;;  %632 = vmatprep.subr.bf16.mxu1 %v631_v32  ;;  %v727_v30 = vpack.c.bf16 %v437_v22, %v436_v21  ;;  %v421_v32 = vld [vmem:[%s995_s3 + $0x18] sm:$0xff]  ;;  %v442_v49 = vld [vmem:[%s995_s3 + $0xc0] sm:$0xff]  ;;  %v737_v51 = vpack.c.bf16 %v425_v47, %v424_v46  ;;  %v444_v55 = vld [vmem:[%s995_s3 + $0xd0] sm:$0xff] }
  0x49   :  { %v729_v36 = vpack.c.bf16 %v421_v32, %v420_v31  ;;  %v428_v59 = vld [vmem:[%s995_s3 + $0x50] sm:$0xff]  ;;  %v429_v60 = vld [vmem:[%s995_s3 + $0x58] sm:$0xff]  ;;  %v446_v61 = vld [vmem:[%s995_s3 + $0xe0] sm:$0xff] }
  0x4a   :  { %v745_v63 = vpack.c.bf16 %v429_v60, %v428_v59  ;;  %v431_v2 = vld [vmem:[%s995_s3 + $0x68] sm:$0xff]  ;;  %v448_v4 = vld [vmem:[%s995_s3 + $0xf0] sm:$0xff]  ;;  %v449_v5 = vld [vmem:[%s995_s3 + $0xf8] sm:$0xff] }
  0x4b   :  { %702 = vmatpush1.bf16.msra.mxu0 %v701_v38  ;;  %634 = vmatpush1.bf16.msra.mxu1 %v633_v41  ;;  %v422_v38 = vld [vmem:[%s995_s3 + $0x20] sm:$0xff]  ;;  %v440_v41 = vld [vmem:[%s995_s3 + $0xb0] sm:$0xff]  ;;  %v751_v6 = vpack.c.bf16 %v449_v5, %v448_v4  ;;  %v433_v8 = vld [vmem:[%s995_s3 + $0x78] sm:$0xff] }
  0x4c   :  { %704 = vmatprep.subr.bf16.mxu0 %v703_v42  ;;  %636 = vmatprep.subr.bf16.mxu1 %v635_v44  ;;  %v441_v42 = vld [vmem:[%s995_s3 + $0xb8] sm:$0xff]  ;;  %v733_v43 = vpack.c.bf16 %v423_v39, %v422_v38  ;;  %v180_v44 = vld [vmem:[#allocation2 + $0x460] sm:$0x1]  ;;  %v432_v7 = vld [vmem:[%s995_s3 + $0x70] sm:$0xff] }
  0x4d   :  { %v735_v45 = vpack.c.bf16 %v441_v42, %v440_v41  ;;  %v753_v9 = vpack.c.bf16 %v433_v8, %v432_v7  ;;  %v182_v13 = vld [vmem:[%s994_s2] sm:$0x3]  ;;  %s818_s2 = smov [#allocation5]  }
  0x4e   :  { %s535_s29 = sshll.u32 %s818_s2, 4  ;;  %s536_s29 = int_to_ptr.vmem [resolvable:$true] %s535_s29 }
  0x4f   :  { %706 = vmatpush1.bf16.msra.mxu0 %v705_v50  ;;  %638 = vmatpush1.bf16.msra.mxu1 %v637_v53  ;;  %v443_v50 = vld [vmem:[%s995_s3 + $0xc8] sm:$0xff]  ;;  %v426_v53 = vld [vmem:[%s995_s3 + $0x40] sm:$0xff]  ;;  %s788_s30 = scalar_lea.vmem %s536_s29, 128  ;;  %p793_p9 = scmp.lt.s32.totalorder %s536_s29, %s536_s29 }
  0x50   :  { %708 = vmatprep.subr.bf16.mxu0 %v707_v54  ;;  %640 = vmatprep.subr.bf16.mxu1 %v639_v56  ;;  %v739_v52 = vpack.c.bf16 %v443_v50, %v442_v49  ;;  %v427_v54 = vld [vmem:[%s995_s3 + $0x48] sm:$0xff]  ;;  %v445_v56 = vld [vmem:[%s995_s3 + $0xd8] sm:$0xff]  ;;  %p789_p8 = scmp.ne.s32.totalorder %s536_s29, %s788_s30  ;;  %p794_p10 = scmp.lt.s32.totalorder %s788_s30, %s788_s30 }
  0x51   :  { %v741_v57 = vpack.c.bf16 %v427_v54, %v426_v53  ;;  %v743_v58 = vpack.c.bf16 %v445_v56, %v444_v55 }
  0x52   :  { %p795_p11 = por %p794_p10, %p793_p9 }
  0x53   :  { %710 = vmatpush1.bf16.msra.mxu0 %v709_v62  ;;  %642 = vmatpush1.bf16.msra.mxu1 %v641_v0  ;;  %v447_v62 = vld [vmem:[%s995_s3 + $0xe8] sm:$0xff] }
  0x54   :  { %712 = vmatprep.subr.bf16.mxu0 %v711_v1  ;;  %644 = vmatprep.subr.bf16.mxu1 %v643_v3  ;;  %v747_v0 = vpack.c.bf16 %v447_v62, %v446_v61  ;;  %v430_v1 = vld [vmem:[%s995_s3 + $0x60] sm:$0xff]  ;;  %p796_p12 = pnand %p795_p11, %p789_p8 }
  0x55   :  { %v749_v3 = vpack.c.bf16 %v431_v2, %v430_v1 }
  0x56   :  { %341 = vmatmul.mubr.f32.vlgmr.msra.gmra.mrb[0].mxu0 %v37_v10  ;;  %v184_v10 = vlaneseq }
  0x57   :  { %714 = vmatpush1.bf16.msra.mxu0 %v713_v11  ;;  %646 = vmatpush1.bf16.msra.mxu1 %v645_v14 }
  0x58   :  { %716 = vmatprep.subr.bf16.mxu0 %v715_v15  ;;  %411 = vmatprep.mubr.f32.mxu0 %v817_v29  ;;  %v185_v11 = vshrl.u32 %v184_v10, 7 }
  0x59   :  { %724 = vmatprep.subr.bf16.mxu1 %v723_v20 }
  0x5a   :  { %270 = vmatmul.mubr.f32.vlgmr.msra.gmra.mrb[0].mxu1 %v35_v25  ;;  %v186_v12 = vsub.s32 0, %v185_v11  ;;  %v190_v15 = vsub.s32 1, %v185_v11 }
  0x5b   :  { %718 = vmatpush1.bf16.msra.mxu0 %v717_v23  ;;  %726 = vmatpush3.bf16.msra.mxu1 %v725_v26  ;;  %v547_v26 = vld [vmem:[%s996_s4] ss:$0 sm:$0xff] }
  0x5c   :  { %720 = vmatprep.subr.bf16.mxu0 %v719_v27  ;;  %728 = vmatprep.subr.bf16.mxu1 %v727_v30  ;;  %v187_v17 = vrot.slane %v182_v13, %v186_v12  ;;  %v191_v18 = vrot.slane %v182_v13, %v190_v15 }
  0x5f   :  { %722 = vmatpush1.bf16.msra.mxu0 %v721_v35  ;;  %730 = vmatpush3.bf16.msra.mxu1 %v729_v36 }
  0x60   :  { %544 = vmatprep.subr.msk.mxu0 %vm198_vm0, %v181_v40  ;;  %732 = vmatprep.subr.bf16.mxu1 %v731_v37 }
  0x63   :  { %545 = vmatpush1.msk.msra.mxu0 %vm198_vm0, %v180_v44  ;;  %734 = vmatpush3.bf16.msra.mxu1 %v733_v43 }
  0x64   :  { %546 = vmatmul.mubr.msk.f32.vlgmr.msra.gmra.mrb[0].mxu0 %vm194_vm1, %v39_v48  ;;  %736 = vmatprep.subr.bf16.mxu1 %v735_v45 }
  0x67   :  { %738 = vmatpush3.bf16.msra.mxu1 %v737_v51 }
  0x68   :  { %740 = vmatprep.subr.bf16.mxu1 %v739_v52 }
  0x6b   :  { %742 = vmatpush3.bf16.msra.mxu1 %v741_v57 }
  0x6c   :  { %744 = vmatprep.subr.bf16.mxu1 %v743_v58 }
  0x6f   :  { %746 = vmatpush3.bf16.msra.mxu1 %v745_v63 }
  0x70   :  { %748 = vmatprep.subr.bf16.mxu1 %v747_v0 }
  0x73   :  { %750 = vmatpush3.bf16.msra.mxu1 %v749_v3 }
  0x74   :  { %752 = vmatprep.subr.bf16.mxu1 %v751_v6 }
  0x77   :  { %754 = vmatpush3.bf16.msra.mxu1 %v753_v9 }
 0x12d   :  { %v271_v14 = vpop.f32.mrb[0].mxu1 }
 0x12e   :  { %v273_v16 = vpop.f32.mrb[1].mxu1  ;;  %v272_v19 = vadd.f32 %v271_v14, %v187_v17 }
 0x12f   :  { %v274_v20 = vadd.f32 %v273_v16, %v191_v18 }
 0x137   :  { %v413_v21 = vpop.f32.mrb[0].mxu0 }
 0x138   :  { %v756_v22 = vadd.f32 %v413_v21, %v272_v19  ;;  %v415_v23 = vpop.f32.mrb[1].mxu0 }
 0x139   :  { %v758_v24 = vadd.f32 %v415_v23, %v274_v20 }
 0x13b   :  { %521 = vmatprep.mubr.f32.mxu1 %v758_v24 }
 0x13c   :  { %522 = vmatmul.mubr.f32.vlgmr.msra.gmra.mrb[2].mxu1 %v756_v22 }
 0x20f   :  { %v580_v25 = vpop.f32.mrb[2].mxu1 }
 0x210   :  { %v581_v27 = vpop.f32.mrb[3].mxu1 }
 0x211   :  { %v582_v28 = vadd.f32 %v581_v27, %v580_v25 }
 0x213   :  { %v524_v29 = vadd.f32 %v582_v28, %v547_v26 }
 0x215   :  { %528 = vst.msk [vmem:[#allocation5] sm:$0xff] %vm527_vm2, %v524_v29 }
 0x216   :  { %799 = shalt.err (!%p796_p12)
}
 0x217   :  { %s800_s7 = scalar_lea.hbm %s997_s5, 128 }
 0x218   :  { %p801_p13 = scmp.ne.s32.totalorder %s997_s5, %s800_s7  ;;  %p804_p0 = scmp.lt.u32.totalorder %s800_s7, %s997_s5 }
 0x21a   :  { %p806_p1 = pnand %p804_p0, %p801_p13 }
 0x21c   :  { %809 = shalt.err (!%p806_p1)
}
 0x21d   :  { %538 = dma.vmem_to_hbm [thread:$0]  %s536_s29, 128, %s997_s5, [#allocation4]  }
 0x21e   :  { %812 = dma.done.wait [#allocation4], 128  }
 0x21f   :  { %813 = vsyncadd [#allocation4], 4294967168 }
 0x220   :  { %542 = vsyncpa [#allocation3], 1 }
 0x221   :  { %543 = vsyncpa [#allocation4], 1 }

</bundles_post_ra>
